<compile_context>
chip_gen: v7x
topology: tpu7x:2x2x1
jax: 0.10.0
libtpu: 0.0.40
codegen_flags: <defaults>
</compile_context>

<pallas_src>
import functools

import jax
import jax.numpy as jnp
from jax.experimental import pallas as pl
from jax.experimental.pallas import tpu as pltpu


_LANE = 128
_SMALL_CUTOFF_BYTES = 1 << 20  # below ~1 MiB a plain jnp.mean beats any kernel launch


def _sublane_tile(dtype_bytes: int) -> int:
    # Native sublane packing: 8 rows for 4-byte, 16 for 2-byte, 32 for 1-byte dtypes.
    return max(8, 32 // dtype_bytes)


def _tpu_budgets():
    """Return (input double-buffer byte budget, vmem_limit_bytes, TCs per chip)."""
    vmem = 64 * 1024 * 1024  # conservative default == v7x per-TC VMEM
    try:
        vmem = int(pltpu.get_tpu_info().vmem_capacity_bytes)
    except Exception:
        pass
    if vmem >= 100 * 1024 * 1024:
        # v5e / v6e: 128 MiB VMEM, single TensorCore -> big tiles, no sharding needed.
        return 40 * 1024 * 1024, 100 * 1024 * 1024, 1
    # v7x (or unknown): 64 MiB VMEM per TC, 2 TCs per chip.
    limit = min(48 * 1024 * 1024, (vmem * 3) // 4)
    budget = min(16 * 1024 * 1024, limit // 3)
    return budget, limit, 2


def _choose_tiles(m: int, d2: int, dtype_bytes: int, budget: int):
    """Pick (tm, tn): prefer full-width lane tiles; derive tm purely from VMEM budget."""
    sub = _sublane_tile(dtype_bytes)
    d2_pad = pl.cdiv(d2, _LANE) * _LANE  # lane-padded VMEM footprint per row
    max_tm = budget // (2 * d2_pad * dtype_bytes)
    if max_tm >= min(m, sub):
        tn = d2  # full width: contiguous row DMAs, fewest grid steps
    else:
        # Enormous D2: split the lane axis so at least one sublane tile of rows fits.
        tn = max(_LANE, (budget // (2 * sub * dtype_bytes)) // _LANE * _LANE)
        max_tm = budget // (2 * tn * dtype_bytes)
    if m <= sub:
        tm = m
    else:
        tm = max(sub, (min(max_tm, m) // sub) * sub)
    return tm, tn


def _mean_dim_kernel(x_ref, o_ref, acc_ref, *, m_total, tm, tiles_per_group,
                     acc_rows, any_overhang):
    g = pl.program_id(0)  # row-group axis ('parallel' -> megacore sharding on v7x)
    i = pl.program_id(2)  # reduction (row-tile) axis, innermost, 'arbitrary'

    @pl.when(i == 0)
    def _init():
        acc_ref[...] = jnp.zeros_like(acc_ref)

    # Early f32 cast (v5e VPU has no bf16 math); compute stays far below DMA time.
    x = x_ref[...].astype(jnp.float32)

    def _accum(v):
        if tm > acc_rows:
            # Fold groups of `acc_rows` sublanes with plain vreg adds; the final
            # cross-sublane collapse happens once, outside the kernel.
            v = v.reshape(tm // acc_rows, acc_rows, v.shape[-1]).sum(axis=0)
        acc_ref[...] += v

    if not any_overhang:
        _accum(x)
    else:
        tile_start = (g * tiles_per_group + i) * tm
        overhangs = tile_start + tm > m_total

        @pl.when(jnp.logical_not(overhangs))
        def _full_tile():
            _accum(x)

        @pl.when(overhangs)
        def _masked_tile():
            # (tm, 1) sublane iota -> only the overhanging tile pays for the mask.
            row = jax.lax.broadcasted_iota(jnp.int32, (tm, 1), 0) + tile_start
            _accum(jnp.where(row < m_total, x, 0.0))

    @pl.when(i == pl.num_programs(2) - 1)
    def _finalize():
        # 1/M is a compile-time Python float (not recomputed from traced values).
        o_ref[...] = (acc_ref[...] * (1.0 / m_total)).astype(o_ref.dtype)


def mean_dim_tensor(x: jax.Array, *, tm: int | None = None,
                    n_groups: int | None = None) -> jax.Array:
    """Equivalent of MeanDimTensor.forward: x.mean(dim=(0, 1), keepdim=False)."""
    if x.ndim < 2:
        raise ValueError("mean over dims (0, 1) needs rank >= 2")
    out_tail = x.shape[2:]
    m = x.shape[0] * x.shape[1]
    d2 = 1
    for s in out_tail:
        d2 *= s
    dtype_bytes = jnp.dtype(x.dtype).itemsize
    sub = _sublane_tile(dtype_bytes)

    forced = (tm is not None) or (n_groups is not None)
    if not forced and (m == 0 or d2 == 0 or m * d2 * dtype_bytes < _SMALL_CUTOFF_BYTES):
        # Kernel launch / grid overhead dominates tiny inputs (incl. 4x4x4 harness).
        return jnp.mean(x, axis=(0, 1))

    x2d = x.reshape(m, d2)
    budget, vmem_limit, cores = _tpu_budgets()
    auto_tm, tn = _choose_tiles(m, d2, dtype_bytes, budget)

    if tm is None:
        tm = auto_tm
        # Guarantee >= `cores` row tiles so both v7x TensorCores share the HBM read.
        if (n_groups is None) and cores > 1 and m >= cores * sub:
            tm = min(tm, max(sub, (pl.cdiv(m, cores) // sub) * sub))
    else:
        tm = max(1, min(int(tm), m))
        if tm < m and tm % 8 != 0:
            tm = max(8, (tm // 8) * 8)

    n_rows_total = pl.cdiv(m, tm)
    if n_groups is None:
        n_groups = min(cores, n_rows_total)
    else:
        n_groups = max(1, min(int(n_groups), n_rows_total))
    tiles_per_group = pl.cdiv(n_rows_total, n_groups)
    n_cols = pl.cdiv(d2, tn)

    acc_rows = 8 if tm % 8 == 0 else tm
    any_overhang = n_groups * tiles_per_group * tm != m

    def in_map(g, j, i):
        # Clamp so padded tail tiles (group remainder) never index past the array;
        # their rows are zeroed by the in-kernel mask anyway.
        return (jnp.minimum(g * tiles_per_group + i, n_rows_total - 1), j)

    if tn < d2 and tn * dtype_bytes < 2048:
        # Short strided DMA runs expose descriptor latency; deepen the pipeline.
        in_spec = pl.BlockSpec((tm, tn), in_map, pipeline_mode=pl.Buffered(3))
    else:
        in_spec = pl.BlockSpec((tm, tn), in_map)

    kernel = functools.partial(
        _mean_dim_kernel, m_total=m, tm=tm, tiles_per_group=tiles_per_group,
        acc_rows=acc_rows, any_overhang=any_overhang)

    partials = pl.pallas_call(
        kernel,
        out_shape=jax.ShapeDtypeStruct((n_groups * acc_rows, d2), jnp.float32),
        grid=(n_groups, n_cols, tiles_per_group),  # reduction axis last
        in_specs=[in_spec],
        out_specs=pl.BlockSpec((acc_rows, tn), lambda g, j, i: (g, j)),
        scratch_shapes=[pltpu.VMEM((acc_rows, tn), jnp.float32)],
        compiler_params=pltpu.CompilerParams(
            dimension_semantics=("parallel", "parallel", "arbitrary"),
            vmem_limit_bytes=vmem_limit,
        ),
    )(x2d)

    # Each partial row already carries the 1/M scale: collapse groups + sublanes.
    y = jnp.sum(partials, axis=0).astype(x.dtype)
    return y.reshape(out_tail)


if __name__ == "__main__":
    key = jax.random.PRNGKey(0)

    # 1) Module's own harness shape: torch.rand(4, 4, 4) -> tiny-input fallback path.
    x_small = jax.random.uniform(key, (4, 4, 4), dtype=jnp.float32)
    y_small = mean_dim_tensor(x_small)
    jax.block_until_ready(y_small)
    assert y_small.shape == (4,)
    assert jnp.allclose(y_small, jnp.mean(x_small, axis=(0, 1)), atol=1e-6, rtol=1e-5)

    # 2) Above the cutoff: default Pallas path (full-width lane tiles; on v7x the
    #    heuristic splits rows across two parallel groups automatically).
    x_mid = jax.random.uniform(jax.random.PRNGKey(0), (8, 64, 768), dtype=jnp.float32)
    y_mid = mean_dim_tensor(x_mid)
    jax.block_until_ready(y_mid)
    assert y_mid.shape == (768,)
    assert jnp.allclose(y_mid, jnp.mean(x_mid, axis=(0, 1)), atol=1e-5, rtol=1e-5)

    # 3) Forced tiling: multiple row tiles, two parallel row groups, and a masked
    #    overhanging final tile (240 rows, tm=64).
    x_big = jax.random.uniform(jax.random.PRNGKey(0), (6, 40, 256), dtype=jnp.float32)
    y_big = mean_dim_tensor(x_big, tm=64, n_groups=2)
    jax.block_until_ready(y_big)
    assert y_big.shape == (256,)
    assert jnp.allclose(y_big, jnp.mean(x_big, axis=(0, 1)), atol=1e-6, rtol=1e-5)

    # 4) Group remainder: 6 row tiles over 4 groups -> fully-out-of-range padded
    #    tiles exercise the clamped index_map + row mask.
    x_rag = jax.random.uniform(jax.random.PRNGKey(0), (5, 50, 128), dtype=jnp.float32)
    y_rag = mean_dim_tensor(x_rag, tm=48, n_groups=4)
    jax.block_until_ready(y_rag)
    assert y_rag.shape == (128,)
    assert jnp.allclose(y_rag, jnp.mean(x_rag, axis=(0, 1)), atol=1e-6, rtol=1e-5)

    print("KERNEL_OK")
</pallas_src>

<mosaic_0001>
module attributes {stable_mosaic.version = 11 : i64} {
  func.func @_mean_dim_kernel(%arg0: i32, %arg1: i32, %arg2: i32, %arg3: memref<256x768xf32, #tpu.memory_space<vmem>>, %arg4: memref<8x768xf32, #tpu.memory_space<vmem>>, %arg5: memref<8x768xf32, #tpu.memory_space<vmem>>) attributes {dimension_semantics = [#tpu.dimension_semantics<parallel>, #tpu.dimension_semantics<parallel>, #tpu.dimension_semantics<arbitrary>], iteration_bounds = array<i64: 2, 1, 1>, scalar_prefetch = 0 : i64, scratch_operands = 1 : i64, tpu.core_type = #tpu.core_type<tc>, window_params = [{transform_indices = @transform_0, window_bounds = array<i64: 256, 768>}, {transform_indices = @transform_1, window_bounds = array<i64: 8, 768>}]} {
    %c0_i32 = arith.constant 0 : i32
    %0 = arith.cmpi eq, %arg2, %c0_i32 : i32
    %1 = arith.extui %0 : i1 to i32
    %c0_i32_0 = arith.constant 0 : i32
    %2 = arith.cmpi ne, %1, %c0_i32_0 : i32
    scf.if %2 {
      %cst_8 = arith.constant 0.000000e+00 : f32
      %12 = vector.broadcast %cst_8 : f32 to vector<8x768xf32>
      %c0_9 = arith.constant 0 : index
      %c0_10 = arith.constant 0 : index
      %13 = vector.load %arg5[%c0_9, %c0_10] : memref<8x768xf32, #tpu.memory_space<vmem>>, vector<8x768xf32>
      tpu.vector_store %arg5[%c0_9, %c0_10], %12 {strides = array<i32>} : memref<8x768xf32, #tpu.memory_space<vmem>>, vector<8x768xf32>,
    } else {
    }
    %c0 = arith.constant 0 : index
    %c0_1 = arith.constant 0 : index
    %3 = vector.load %arg3[%c0, %c0_1] : memref<256x768xf32, #tpu.memory_space<vmem>>, vector<256x768xf32>
    %4 = vector.shape_cast %3 : vector<256x768xf32> to vector<32x8x768xf32>
    %cst = arith.constant dense<0.000000e+00> : vector<8x768xf32>
    %5 = vector.multi_reduction <add>, %4, %cst [0] : vector<32x8x768xf32> to vector<8x768xf32>
    %c0_2 = arith.constant 0 : index
    %c0_3 = arith.constant 0 : index
    %6 = vector.load %arg5[%c0_2, %c0_3] : memref<8x768xf32, #tpu.memory_space<vmem>>, vector<8x768xf32>
    %7 = arith.addf %6, %5 : vector<8x768xf32>
    %c0_4 = arith.constant 0 : index
    %c0_5 = arith.constant 0 : index
    %8 = vector.load %arg5[%c0_4, %c0_5] : memref<8x768xf32, #tpu.memory_space<vmem>>, vector<8x768xf32>
    tpu.vector_store %arg5[%c0_4, %c0_5], %7 {strides = array<i32>} : memref<8x768xf32, #tpu.memory_space<vmem>>, vector<8x768xf32>,
    %c0_i32_6 = arith.constant 0 : i32
    %9 = arith.cmpi eq, %arg2, %c0_i32_6 : i32
    %10 = arith.extui %9 : i1 to i32
    %c0_i32_7 = arith.constant 0 : i32
    %11 = arith.cmpi ne, %10, %c0_i32_7 : i32
    scf.if %11 {
      %c0_8 = arith.constant 0 : index
      %c0_9 = arith.constant 0 : index
      %12 = vector.load %arg5[%c0_8, %c0_9] : memref<8x768xf32, #tpu.memory_space<vmem>>, vector<8x768xf32>
      %cst_10 = arith.constant 0.001953125 : f32
      %13 = vector.broadcast %cst_10 : f32 to vector<8x768xf32>
      %14 = arith.mulf %12, %13 : vector<8x768xf32>
      %c0_11 = arith.constant 0 : index
      %c0_12 = arith.constant 0 : index
      %15 = vector.load %arg4[%c0_11, %c0_12] : memref<8x768xf32, #tpu.memory_space<vmem>>, vector<8x768xf32>
      tpu.vector_store %arg4[%c0_11, %c0_12], %14 {strides = array<i32>} : memref<8x768xf32, #tpu.memory_space<vmem>>, vector<8x768xf32>,
    } else {
    }
    return
  }
  func.func @transform_0(%arg0: i32, %arg1: i32, %arg2: i32) -> (i32, i32) {
    %c1_i32 = arith.constant 1 : i32
    %0 = arith.muli %arg0, %c1_i32 : i32
    %1 = arith.addi %0, %arg2 : i32
    %c1_i32_0 = arith.constant 1 : i32
    %2 = arith.minsi %1, %c1_i32_0 : i32
    %c0_i32 = arith.constant 0 : i32
    return %2, %arg1 : i32, i32
  }
  func.func @transform_1(%arg0: i32, %arg1: i32, %arg2: i32) -> (i32, i32) {
    %c0_i32 = arith.constant 0 : i32
    return %arg0, %arg1 : i32, i32
  }
}

</mosaic_0001>

<bundles_post_ra>
// kernel: tpu_custom_call.1
= control target key start
LH: loop header
LB: loop body
LE: loop exit
PB: predicated region body
PF: predicated region fallthrough
CT: control target
= control target key end

     0   :  { %6 = vsyncpa [#allocation4], 0  ;;  %s1376_s0 = inlined_call_operand.hbm [shape: f32[512,768], index: 0, kind: input, shape index: {}]   ;;  %s1377_s1 = inlined_call_operand.hbm [shape: f32[16,768], index: 1, kind: output, shape index: {}]  }
   0x1   :  { %8 = vsyncpa [#allocation4 + $0x1], 0 }
   0x2   :  { %9 = vsyncpa [#allocation5], 0 }
   0x3   :  { %11 = vsyncpa [#allocation5 + $0x1], 0  ;;  %s963_s6 = smov 0   ;;  %s965_s7 = smov 0  }
   0x4   :  { %s967_s8 = smov 0   ;;  %s969_s9 = smov 0  }
   0x5   :  { %s971_s10 = smov 0   ;;  %s973_s11 = smov 0  }
   0x6   :  { %s975_s12 = smov 0   ;;  %s977_s13 = smov 0  }
   0x7   :  { %s979_s14 = smov 0  }
   0x8 LB: > { %s707_s15 = sadd.s32 4294967295, %s947_s14   ;;  %s708_s16 = sadd.s32 4294967294, %s947_s14   ;;  %s947_s14 = sphi %s979_s14, %s17_s14   ;;  %s943_s13 = sphi %s977_s13, %s1394_s13   ;;  %s939_s12 = sphi %s975_s12, %s1393_s12   ;;  %s935_s11 = sphi %s973_s11, %s1392_s11   ;;  %s931_s10 = sphi %s971_s10, %s1391_s10   ;;  %s927_s9 = sphi %s969_s9, %s1390_s9   ;;  %s923_s8 = sphi %s967_s8, %s1389_s8   ;;  %s919_s7 = sphi %s965_s7, %s1388_s7   ;;  %s915_s6 = sphi %s963_s6, %s1387_s6  }
   0x9   : > { %s36_s17 = sadd.s32 1, %s943_s13  ;;  %p41_p0 = scmp.lt.s32.totalorder %s943_s13, 1 }
   0xa   : > { %p38_p1 = scmp.ge.s32.totalorder %s36_s17, 2  ;;  %s51_s18 = sadd.s32 1, %s935_s11 }
   0xb   : > { %s1012_s19 = scalar_select %p41_p0, %s943_s13, 1 }
   0xc   : > { %s1396_s17 = smov (%p38_p1, %s36_s17), 0  ;;  %p58_p2 = scmp.ne.s32.totalorder %s935_s11, %s931_s10 }
   0xd   : > { %p59_p3 = scmp.eq.s32.totalorder %s947_s14, 0  ;;  %p44_p4 = scmp.lt.s32.totalorder %s1396_s17, 1 }
   0xe   : > { %p64_p5 = scmp.ne.s32.totalorder %s931_s10, %s927_s9  ;;  %p65_p7 = scmp.eq.s32.totalorder %s707_s15, 0 }
   0xf   : > { %p1021_p6 = por %p59_p3, %p58_p2  ;;  %s74_s23 = ssub.s32 %s943_s13, %s1396_s17 }
  0x10   : > { %s45_s21 = scalar_select %p44_p4, %s1396_s17, 1 }
  0x11   : > { %p1026_p8 = por %p65_p7, %p64_p5  ;;  %p77_p9 = scmp.eq.s32.totalorder %s74_s23, 0 }
  0x12   : > { %s46_s24 = ssub.s32 %s1012_s19, %s45_s21  ;;  %s79_s25 = sadd.s32 1, %s923_s8 }
  0x13   : > { %p49_p10 = scmp.eq.s32.totalorder %s46_s24, 0  ;;  %p89_p11 = scmp.ne.s32.totalorder %s923_s8, %s919_s7 }
  0x14   : > { %s1035_s26 = scalar_select %p77_p9, %s923_s8, %s79_s25  }
  0x15   : > { %s1038_s27 = scalar_select %p49_p10, %s935_s11, %s51_s18  }
  0x16   : > { %p90_p12 = scmp.eq.s32.totalorder %s707_s15, 1  ;;  %p95_p13 = scmp.ne.s32.totalorder %s919_s7, %s915_s6 }
  0x17   : > { %p96_p0 = scmp.eq.s32.totalorder %s708_s16, 1  ;;  %p735_p4 = scmp.lt.s32.totalorder %s947_s14, 2 }
  0x18   : > { %p1044_p1 = por %p90_p12, %p89_p11  ;;  %s116_s30 = sand.u32 1, %s935_s11  }
  0x19   : > { %p1049_p3 = por %p96_p0, %p95_p13  ;;  %s719_s2 = smul.u32 24576, %s1012_s19 }
  0x1a   : > { %s1381_s28 = scalar_select %p1044_p1, 1, 0 }
  0x1b   : > { %s1382_s29 = scalar_select %p1049_p3, 1, 0 }
  0x1c   : > { %s718_s3 = smul.u32 1536, %s116_s30  ;;  %s1059_s9 = scalar_lea.hbm %s1376_s0, %s719_s2 }
  0x1d   : > { %p1063_p5 = pnand %p735_p4, %p1021_p6  ;;  %s1069_s19 = scalar_lea.sflag [#allocation4], %s116_s30 }
  0x1e   : > { %s120_s16 = scalar_lea.vmem [#allocation3], %s718_s3  ;;  %s811_s21 = scalar_lea.hbm %s1059_s9, 24576 }
  0x1f   : > { %s133_s18 = sshll.u32 %s120_s16, 4  ;;  %p812_p7 = scmp.ne.s32.totalorder %s1059_s9, %s811_s21  ;;  %s1067_s18 = int_to_ptr.vmem [resolvable:$true] %s133_s18 }
  0x20   : > { %p813_p9 = pneg %p1063_p5  ;;  %s816_s24 = scalar_lea.hbm %s1376_s0, 49152 }
  0x21   : > { %p817_p6 = scmp.lt.u32.totalorder %s1059_s9, %s1376_s0  ;;  %p818_p12 = scmp.lt.u32.totalorder %s816_s24, %s811_s21 }
  0x22   : > { %p814_p10 = pnand %p813_p9, %p812_p7  ;;  %p820_p0 = scmp.lt.u32.totalorder %s811_s21, %s1059_s9 }
  0x23   : > { %p819_p13 = por %p818_p12, %p817_p6 }
  0x24   : > { %p815_p11 = pneg %p814_p10 }
  0x25   : > { %p821_p4 = por %p820_p0, %p819_p13 }
  0x27   : > { %p822_p2 = pnand %p821_p4, %p815_p11 }
  0x29   : > { %825 = shalt.err (!%p822_p2)
}
  0x2a   : > { %s826_s30 = scalar_lea.vmem %s1067_s18, 24576  ;;  %s949_s3 = smov [#allocation3]  }
  0x2b   : > { %p827_p7 = scmp.ne.s32.totalorder %s1067_s18, %s826_s30  ;;  %s831_s4 = sshll.u32 %s949_s3, 4  ;;  %s832_s4 = int_to_ptr.vmem [resolvable:$false] %s831_s4 }
  0x2c   : > { %s833_s5 = scalar_lea.vmem %s832_s4, 49152  ;;  %p834_p1 = scmp.lt.s32.totalorder %s1067_s18, %s832_s4 }
  0x2d   : > { %p829_p10 = pnand %p827_p7, %p813_p9  ;;  %p835_p6 = scmp.lt.s32.totalorder %s833_s5, %s826_s30 }
  0x2f   : > { %p830_p3 = pneg %p829_p10  ;;  %p836_p12 = por %p835_p6, %p834_p1 }
  0x31   : > { %p837_p13 = pnand %p836_p12, %p830_p3 }
  0x33   : > { %840 = shalt.err (!%p837_p13)
}
  0x34   : > { %s950_s16 = smov 768   ;;  %s951_s21 = smov 48  }
  0x35   : > { %730 = dma.hbm_to_vmem [thread:$0]  (!%p1063_p5), %s1059_s9, 24576, %s1067_s18, %s1069_s19, %s950_s16, %s950_s16, %s951_s21  }
  0x36   : > { %p714_p2 = scmp.ge.s32.totalorder %s947_s14, 1  ;;  %p141_p9 = scmp.lt.s32.totalorder %s947_s14, 3 }
  0x38   : > { %p142_p11 = pnand %p714_p2, %p141_p9 }
  0x39   : > { %s147_s20 = sand.u32 (!%p142_p11), 1, %s931_s10  }
  0x3a   : > { %145 = sbr.rel (%p142_p11) target bundleno = 193 (0xc1), region = 24  ;;  %s148_s24 = scalar_lea.sflag (!%p142_p11), [#allocation4], %s147_s20 }
  0x3b   : > { %s720_s23 = smul.u32 (!%p142_p11), 1536, %s147_s20 }
  0x3d   : > { %s1100_s25 = scalar_lea.vmem (!%p142_p11), [#allocation3], %s720_s23 }
  0x41   : > { %906 = dma.done.wait (%p1026_p8), %s148_s24, 24576  }
  0x42   : > { %908 = vsyncadd (%p1026_p8), %s148_s24, 4294942720  ;;  %v186_v0 = vld [vmem:[%s1100_s25] sm:$0xff]  ;;  %v192_v1 = vld [vmem:[%s1100_s25 + $0x30] sm:$0xff]  ;;  %s167_s22 = sand.u32 1, %s919_s7   ;;  %s722_s18 = smul.u32 768, %s939_s12 }
  0x43   : > { %v198_v2 = vld [vmem:[%s1100_s25 + $0x60] sm:$0xff]  ;;  %v378_v3 = vadd.f32 %v192_v1, %v186_v0  ;;  %v204_v4 = vld [vmem:[%s1100_s25 + $0x90] sm:$0xff]  ;;  %v187_v13 = vld [vmem:[%s1100_s25 + $0x8] sm:$0xff]  ;;  %s1217_s9 = smul.u32 48, %s167_s22  ;;  %s604_s4 = scalar_lea.sflag [#allocation5], %s167_s22 }
  0x44   : > { %v210_v6 = vld [vmem:[%s1100_s25 + $0xc0] sm:$0xff]  ;;  %v216_v8 = vld [vmem:[%s1100_s25 + $0xf0] sm:$0xff]  ;;  %v193_v15 = vld [vmem:[%s1100_s25 + $0x38] sm:$0xff]  ;;  %s1318_s3 = scalar_lea.hbm %s1377_s1, %s722_s18  ;;  %p1384_p1 = scmp.ne.s32.totalorder %s1381_s28, 0 }
  0x45   : > { %v379_v5 = vadd.f32 %v378_v3, %v198_v2  ;;  %v222_v10 = vld [vmem:[%s1100_s25 + $0x120] sm:$0xff]  ;;  %v228_v12 = vld [vmem:[%s1100_s25 + $0x150] sm:$0xff]  ;;  %v199_v16 = vld [vmem:[%s1100_s25 + $0x68] sm:$0xff]  ;;  %v409_v18 = vadd.f32 %v193_v15, %v187_v13  ;;  %s1238_s15 = scalar_lea.vmem [#allocation6], %s1217_s9  ;;  %s952_s12 = smov [#allocation6]  }
  0x46   : > { %v234_v17 = vld [vmem:[%s1100_s25 + $0x180] sm:$0xff]  ;;  %v205_v20 = vld [vmem:[%s1100_s25 + $0x98] sm:$0xff]  ;;  %v240_v21 = vld [vmem:[%s1100_s25 + $0x1b0] sm:$0xff]  ;;  %s620_s19 = sshll.u32 %s1238_s15, 4  ;;  %s845_s16 = sshll.u32 %s952_s12, 4  ;;  %s1313_s19 = int_to_ptr.vmem [resolvable:$true] %s620_s19  ;;  %s846_s16 = int_to_ptr.vmem [resolvable:$false] %s845_s16 }
  0x47   : > { %v380_v7 = vadd.f32 %v379_v5, %v204_v4  ;;  %v410_v22 = vadd.f32 %v409_v18, %v199_v16  ;;  %v211_v24 = vld [vmem:[%s1100_s25 + $0xc8] sm:$0xff]  ;;  %v246_v25 = vld [vmem:[%s1100_s25 + $0x1e0] sm:$0xff]  ;;  %v217_v28 = vld [vmem:[%s1100_s25 + $0xf8] sm:$0xff]  ;;  %s841_s5 = scalar_lea.vmem %s1313_s19, 768  ;;  %s847_s21 = scalar_lea.vmem %s846_s16, 1536 }
  0x48   : > { %v252_v29 = vld [vmem:[%s1100_s25 + $0x210] sm:$0xff]  ;;  %v223_v32 = vld [vmem:[%s1100_s25 + $0x128] sm:$0xff]  ;;  %v258_v33 = vld [vmem:[%s1100_s25 + $0x240] sm:$0xff]  ;;  %p842_p8 = scmp.ne.s32.totalorder %s1313_s19, %s841_s5  ;;  %p848_p0 = scmp.lt.s32.totalorder %s1313_s19, %s846_s16 }
  0x49   : > { %v381_v9 = vadd.f32 %v380_v7, %v210_v6  ;;  %v411_v26 = vadd.f32 %v410_v22, %v205_v20  ;;  %v229_v36 = vld [vmem:[%s1100_s25 + $0x158] sm:$0xff]  ;;  %v188_v37 = vld [vmem:[%s1100_s25 + $0x10] sm:$0xff]  ;;  %v194_v38 = vld [vmem:[%s1100_s25 + $0x40] sm:$0xff]  ;;  %p849_p4 = scmp.lt.s32.totalorder %s847_s21, %s841_s5 }
  0x4a   : > { %v264_v39 = vld [vmem:[%s1100_s25 + $0x270] sm:$0xff]  ;;  %v440_v42 = vadd.f32 %v194_v38, %v188_v37  ;;  %v235_v44 = vld [vmem:[%s1100_s25 + $0x188] sm:$0xff]  ;;  %v206_v45 = vld [vmem:[%s1100_s25 + $0xa0] sm:$0xff]  ;;  %p843_p3 = pnand %p842_p8, %p1384_p1 }
  0x4b   : > { %v382_v11 = vadd.f32 %v381_v9, %v216_v8  ;;  %v412_v30 = vadd.f32 %v411_v26, %v211_v24  ;;  %v200_v41 = vld [vmem:[%s1100_s25 + $0x70] sm:$0xff]  ;;  %v270_v46 = vld [vmem:[%s1100_s25 + $0x2a0] sm:$0xff]  ;;  %v241_v50 = vld [vmem:[%s1100_s25 + $0x1b8] sm:$0xff]  ;;  %p850_p7 = por %p849_p4, %p848_p0 }
  0x4c   : > { %v441_v48 = vadd.f32 %v440_v42, %v200_v41  ;;  %v212_v51 = vld [vmem:[%s1100_s25 + $0xd0] sm:$0xff]  ;;  %v247_v56 = vld [vmem:[%s1100_s25 + $0x1e8] sm:$0xff]  ;;  %v218_v57 = vld [vmem:[%s1100_s25 + $0x100] sm:$0xff]  ;;  %p844_p5 = pneg %p843_p3 }
  0x4d   : > { %v383_v14 = vadd.f32 %v382_v11, %v222_v10  ;;  %v413_v34 = vadd.f32 %v412_v30, %v217_v28  ;;  %v276_v52 = vld [vmem:[%s1100_s25 + $0x2d0] sm:$0xff]  ;;  %v282_v58 = vld [vmem:[%s1100_s25 + $0x300] sm:$0xff]  ;;  %v253_v62 = vld [vmem:[%s1100_s25 + $0x218] sm:$0xff] }
  0x4e   : > { %v442_v54 = vadd.f32 %v441_v48, %v206_v45  ;;  %v224_v63 = vld [vmem:[%s1100_s25 + $0x130] sm:$0xff]  ;;  %v294_v3 = vld [vmem:[%s1100_s25 + $0x360] sm:$0xff]  ;;  %v259_v5 = vld [vmem:[%s1100_s25 + $0x248] sm:$0xff]  ;;  %p851_p10 = pnand %p850_p7, %p844_p5 }
  0x4f   : > { %v384_v19 = vadd.f32 %v383_v14, %v228_v12  ;;  %v414_v40 = vadd.f32 %v413_v34, %v223_v32  ;;  %v288_v0 = vld [vmem:[%s1100_s25 + $0x330] sm:$0xff]  ;;  %v230_v6 = vld [vmem:[%s1100_s25 + $0x160] sm:$0xff]  ;;  %v189_v9 = vld [vmem:[%s1100_s25 + $0x18] sm:$0xff] }
  0x50   : > { %v443_v60 = vadd.f32 %v442_v54, %v212_v51  ;;  %v195_v10 = vld [vmem:[%s1100_s25 + $0x48] sm:$0xff]  ;;  %v201_v11 = vld [vmem:[%s1100_s25 + $0x78] sm:$0xff]  ;;  %v236_v14 = vld [vmem:[%s1100_s25 + $0x190] sm:$0xff] }
  0x51   : > { %v385_v23 = vadd.f32 %v384_v19, %v234_v17  ;;  %v415_v47 = vadd.f32 %v414_v40, %v229_v36  ;;  %v265_v13 = vld [vmem:[%s1100_s25 + $0x278] sm:$0xff]  ;;  %v471_v15 = vadd.f32 %v195_v10, %v189_v9  ;;  %v300_v16 = vld [vmem:[%s1100_s25 + $0x390] sm:$0xff]  ;;  %v207_v19 = vld [vmem:[%s1100_s25 + $0xa8] sm:$0xff] }
  0x52   : > { %v444_v2 = vadd.f32 %v443_v60, %v218_v57  ;;  %v242_v22 = vld [vmem:[%s1100_s25 + $0x1c0] sm:$0xff]  ;;  %v248_v30 = vld [vmem:[%s1100_s25 + $0x1f0] sm:$0xff]  ;;  %v283_v37 = vld [vmem:[%s1100_s25 + $0x308] sm:$0xff] }
  0x53   : > { %v386_v27 = vadd.f32 %v385_v23, %v240_v21  ;;  %v416_v53 = vadd.f32 %v415_v47, %v235_v44  ;;  %v271_v21 = vld [vmem:[%s1100_s25 + $0x2a8] sm:$0xff]  ;;  %v472_v23 = vadd.f32 %v471_v15, %v201_v11  ;;  %v306_v24 = vld [vmem:[%s1100_s25 + $0x3c0] sm:$0xff]  ;;  %v312_v32 = vld [vmem:[%s1100_s25 + $0x3f0] sm:$0xff] }
  0x54   : > { %v445_v8 = vadd.f32 %v444_v2, %v224_v63  ;;  %v254_v38 = vld [vmem:[%s1100_s25 + $0x220] sm:$0xff]  ;;  %v324_v44 = vld [vmem:[%s1100_s25 + $0x450] sm:$0xff]  ;;  %v307_v11 = vld [vmem:[%s1100_s25 + $0x3c8] sm:$0xff] }
  0x55   : > { %v387_v31 = vadd.f32 %v386_v27, %v246_v25  ;;  %v417_v59 = vadd.f32 %v416_v53, %v241_v50  ;;  %v213_v27 = vld [vmem:[%s1100_s25 + $0xd8] sm:$0xff]  ;;  %v318_v40 = vld [vmem:[%s1100_s25 + $0x420] sm:$0xff]  ;;  %v260_v47 = vld [vmem:[%s1100_s25 + $0x250] sm:$0xff] }
  0x56   : > { %v446_v18 = vadd.f32 %v445_v8, %v230_v6  ;;  %v190_v53 = vld [vmem:[%s1100_s25 + $0x20] sm:$0xff]  ;;  %v196_v57 = vld [vmem:[%s1100_s25 + $0x50] sm:$0xff]  ;;  %v243_v8 = vld [vmem:[%s1100_s25 + $0x1c8] sm:$0xff] }
  0x57   : > { %v388_v35 = vadd.f32 %v387_v31, %v252_v29  ;;  %v418_v1 = vadd.f32 %v417_v59, %v247_v56  ;;  %v277_v29 = vld [vmem:[%s1100_s25 + $0x2d8] sm:$0xff]  ;;  %v473_v31 = vadd.f32 %v472_v23, %v207_v19  ;;  %v330_v59 = vld [vmem:[%s1100_s25 + $0x480] sm:$0xff]  ;;  %v502_v63 = vadd.f32 %v196_v57, %v190_v53  ;;  %v272_v2 = vld [vmem:[%s1100_s25 + $0x2b0] sm:$0xff] }
  0x58   : > { %v447_v26 = vadd.f32 %v446_v18, %v236_v14  ;;  %v214_v14 = vld [vmem:[%s1100_s25 + $0xe0] sm:$0xff]  ;;  %v249_v18 = vld [vmem:[%s1100_s25 + $0x1f8] sm:$0xff]  ;;  %v203_v53 = vld [vmem:[%s1100_s25 + $0x88] sm:$0xff] }
  0x59   : > { %v389_v43 = vadd.f32 %v388_v35, %v258_v33  ;;  %v419_v7 = vadd.f32 %v418_v1, %v253_v62  ;;  %v219_v35 = vld [vmem:[%s1100_s25 + $0x108] sm:$0xff]  ;;  %v237_v62 = vld [vmem:[%s1100_s25 + $0x198] sm:$0xff]  ;;  %v342_v15 = vld [vmem:[%s1100_s25 + $0x4e0] sm:$0xff] }
  0x5a   : > { %v448_v34 = vadd.f32 %v447_v26, %v242_v22  ;;  %v301_v1 = vld [vmem:[%s1100_s25 + $0x398] sm:$0xff]  ;;  %v284_v22 = vld [vmem:[%s1100_s25 + $0x310] sm:$0xff]  ;;  %v354_v26 = vld [vmem:[%s1100_s25 + $0x540] sm:$0xff] }
  0x5b   : > { %v390_v49 = vadd.f32 %v389_v43, %v264_v39  ;;  %v420_v17 = vadd.f32 %v419_v7, %v259_v5  ;;  %v474_v39 = vadd.f32 %v473_v31, %v213_v27  ;;  %v225_v43 = vld [vmem:[%s1100_s25 + $0x138] sm:$0xff]  ;;  %v336_v5 = vld [vmem:[%s1100_s25 + $0x4b0] sm:$0xff] }
  0x5c   : > { %v449_v42 = vadd.f32 %v448_v34, %v248_v30 }
  0x5d   : > { %v391_v55 = vadd.f32 %v390_v49, %v270_v46  ;;  %v421_v25 = vadd.f32 %v420_v17, %v265_v13  ;;  %v289_v46 = vld [vmem:[%s1100_s25 + $0x338] sm:$0xff]  ;;  %v475_v48 = vadd.f32 %v474_v39, %v219_v35  ;;  %v295_v49 = vld [vmem:[%s1100_s25 + $0x368] sm:$0xff]  ;;  %v226_v35 = vld [vmem:[%s1100_s25 + $0x140] sm:$0xff] }
  0x5e   : > { %v450_v51 = vadd.f32 %v449_v42, %v254_v38  ;;  %v296_v39 = vld [vmem:[%s1100_s25 + $0x370] sm:$0xff] }
  0x5f   : > { %v392_v61 = vadd.f32 %v391_v55, %v276_v52  ;;  %v422_v33 = vadd.f32 %v421_v25, %v271_v21  ;;  %v231_v52 = vld [vmem:[%s1100_s25 + $0x168] sm:$0xff]  ;;  %v266_v55 = vld [vmem:[%s1100_s25 + $0x280] sm:$0xff]  ;;  %v476_v56 = vadd.f32 %v475_v48, %v225_v43  ;;  %v313_v21 = vld [vmem:[%s1100_s25 + $0x3f8] sm:$0xff] }
  0x60   : > { %v348_v25 = vld [vmem:[%s1100_s25 + $0x510] sm:$0xff]  ;;  %v331_v48 = vld [vmem:[%s1100_s25 + $0x488] sm:$0xff] }
  0x61   : > { %v393_v4 = vadd.f32 %v392_v61, %v282_v58  ;;  %v423_v41 = vadd.f32 %v422_v33, %v277_v29  ;;  %v202_v58 = vld [vmem:[%s1100_s25 + $0x80] sm:$0xff]  ;;  %v451_v61 = vadd.f32 %v450_v51, %v260_v47  ;;  %v255_v29 = vld [vmem:[%s1100_s25 + $0x228] sm:$0xff]  ;;  %v197_v47 = vld [vmem:[%s1100_s25 + $0x58] sm:$0xff] }
  0x62   : > { %v503_v9 = vadd.f32 %v502_v63, %v202_v58  ;;  %v290_v33 = vld [vmem:[%s1100_s25 + $0x340] sm:$0xff]  ;;  %v267_v51 = vld [vmem:[%s1100_s25 + $0x288] sm:$0xff] }
  0x63   : > { %v394_v12 = vadd.f32 %v393_v4, %v288_v0  ;;  %v424_v50 = vadd.f32 %v423_v41, %v283_v37  ;;  %v208_v4 = vld [vmem:[%s1100_s25 + $0xb0] sm:$0xff]  ;;  %v452_v7 = vadd.f32 %v451_v61, %v266_v55  ;;  %v325_v37 = vld [vmem:[%s1100_s25 + $0x458] sm:$0xff]  ;;  %v238_v58 = vld [vmem:[%s1100_s25 + $0x1a0] sm:$0xff] }
  0x64   : > { %v504_v19 = vadd.f32 %v503_v9, %v208_v4  ;;  %v261_v41 = vld [vmem:[%s1100_s25 + $0x258] sm:$0xff]  ;;  %v308_v4 = vld [vmem:[%s1100_s25 + $0x3d0] sm:$0xff]  ;;  %v343_v9 = vld [vmem:[%s1100_s25 + $0x4e8] sm:$0xff] }
  0x65   : > { %v395_v20 = vadd.f32 %v394_v12, %v294_v3  ;;  %v425_v60 = vadd.f32 %v424_v50, %v289_v46  ;;  %v477_v3 = vadd.f32 %v476_v56, %v231_v52  ;;  %v278_v12 = vld [vmem:[%s1100_s25 + $0x2e0] sm:$0xff]  ;;  %v453_v17 = vadd.f32 %v452_v7, %v272_v2  ;;  %v191_v46 = vld [vmem:[%s1100_s25 + $0x28] sm:$0xff]  ;;  %v337_v61 = vld [vmem:[%s1100_s25 + $0x4b8] sm:$0xff] }
  0x66   : > { %v505_v30 = vadd.f32 %v504_v19, %v214_v14  ;;  %v302_v56 = vld [vmem:[%s1100_s25 + $0x3a0] sm:$0xff]  ;;  %v215_v7 = vld [vmem:[%s1100_s25 + $0xe8] sm:$0xff]  ;;  %v221_v19 = vld [vmem:[%s1100_s25 + $0x118] sm:$0xff] }
  0x67   : > { %v396_v28 = vadd.f32 %v395_v20, %v300_v16  ;;  %v426_v6 = vadd.f32 %v425_v60, %v295_v49  ;;  %v478_v13 = vadd.f32 %v477_v3, %v237_v62  ;;  %v366_v60 = vld [vmem:[%s1100_s25 + $0x5a0] sm:$0xff] }
  0x69   : > { %v397_v36 = vadd.f32 %v396_v28, %v306_v24  ;;  %v427_v16 = vadd.f32 %v426_v6, %v301_v1  ;;  %v479_v23 = vadd.f32 %v478_v13, %v243_v8  ;;  %v220_v24 = vld [vmem:[%s1100_s25 + $0x110] sm:$0xff]  ;;  %v454_v28 = vadd.f32 %v453_v17, %v278_v12  ;;  %v279_v12 = vld [vmem:[%s1100_s25 + $0x2e8] sm:$0xff] }
  0x6a   : > { %v506_v42 = vadd.f32 %v505_v30, %v220_v24  ;;  %v244_v6 = vld [vmem:[%s1100_s25 + $0x1d0] sm:$0xff]  ;;  %v227_v30 = vld [vmem:[%s1100_s25 + $0x148] sm:$0xff] }
  0x6b   : > { %v398_v45 = vadd.f32 %v397_v36, %v312_v32  ;;  %v428_v27 = vadd.f32 %v427_v16, %v307_v11  ;;  %v319_v32 = vld [vmem:[%s1100_s25 + $0x428] sm:$0xff]  ;;  %v480_v34 = vadd.f32 %v479_v23, %v249_v18  ;;  %v360_v36 = vld [vmem:[%s1100_s25 + $0x570] sm:$0xff]  ;;  %v314_v16 = vld [vmem:[%s1100_s25 + $0x400] sm:$0xff] }
  0x6c   : > { %v507_v52 = vadd.f32 %v506_v42, %v226_v35  ;;  %v372_v8 = vld [vmem:[%s1100_s25 + $0x5d0] sm:$0xff]  ;;  %v250_v18 = vld [vmem:[%s1100_s25 + $0x200] sm:$0xff]  ;;  %v285_v23 = vld [vmem:[%s1100_s25 + $0x318] sm:$0xff] }
  0x6d   : > { %v399_v54 = vadd.f32 %v398_v45, %v318_v40  ;;  %v429_v38 = vadd.f32 %v428_v27, %v313_v21  ;;  %v455_v40 = vadd.f32 %v454_v28, %v284_v22  ;;  %v232_v45 = vld [vmem:[%s1100_s25 + $0x170] sm:$0xff]  ;;  %v361_v42 = vld [vmem:[%s1100_s25 + $0x578] sm:$0xff] }
  0x6e   : > { %v508_v1 = vadd.f32 %v507_v52, %v232_v45  ;;  %v320_v27 = vld [vmem:[%s1100_s25 + $0x430] sm:$0xff]  ;;  %v297_v45 = vld [vmem:[%s1100_s25 + $0x378] sm:$0xff]  ;;  %v367_v52 = vld [vmem:[%s1100_s25 + $0x5a8] sm:$0xff] }
  0x6f   : > { %v400_v0 = vadd.f32 %v399_v54, %v324_v44  ;;  %v481_v44 = vadd.f32 %v480_v34, %v255_v29  ;;  %v430_v49 = vadd.f32 %v429_v38, %v319_v32  ;;  %v456_v50 = vadd.f32 %v455_v40, %v290_v33  ;;  %v256_v29 = vld [vmem:[%s1100_s25 + $0x230] sm:$0xff]  ;;  %v291_v34 = vld [vmem:[%s1100_s25 + $0x348] sm:$0xff]  ;;  %v326_v38 = vld [vmem:[%s1100_s25 + $0x460] sm:$0xff] }
  0x70   : > { %v533_v54 = vadd.f32 %v197_v47, %v191_v46  ;;  %v509_v13 = vadd.f32 %v508_v1, %v238_v58  ;;  %v262_v40 = vld [vmem:[%s1100_s25 + $0x260] sm:$0xff]  ;;  %v309_v1 = vld [vmem:[%s1100_s25 + $0x3d8] sm:$0xff] }
  0x71   : > { %v401_v10 = vadd.f32 %v400_v0, %v330_v59  ;;  %v482_v57 = vadd.f32 %v481_v44, %v261_v41  ;;  %v209_v59 = vld [vmem:[%s1100_s25 + $0xb8] sm:$0xff]  ;;  %v431_v62 = vadd.f32 %v430_v49, %v325_v37  ;;  %v457_v63 = vadd.f32 %v456_v50, %v296_v39  ;;  %v268_v50 = vld [vmem:[%s1100_s25 + $0x290] sm:$0xff]  ;;  %v338_v58 = vld [vmem:[%s1100_s25 + $0x4c0] sm:$0xff] }
  0x72   : > { %v273_v0 = vld [vmem:[%s1100_s25 + $0x2b8] sm:$0xff]  ;;  %v534_v2 = vadd.f32 %v533_v54, %v203_v53  ;;  %v510_v24 = vadd.f32 %v509_v13, %v244_v6  ;;  %v280_v6 = vld [vmem:[%s1100_s25 + $0x2f0] sm:$0xff]  ;;  %v350_v13 = vld [vmem:[%s1100_s25 + $0x520] sm:$0xff] }
  0x73   : > { %v402_v20 = vadd.f32 %v401_v10, %v336_v5  ;;  %v483_v5 = vadd.f32 %v482_v57, %v267_v51  ;;  %v432_v10 = vadd.f32 %v431_v62, %v331_v48  ;;  %v458_v11 = vadd.f32 %v457_v63, %v302_v56  ;;  %v233_v41 = vld [vmem:[%s1100_s25 + $0x178] sm:$0xff]  ;;  %v332_v48 = vld [vmem:[%s1100_s25 + $0x490] sm:$0xff]  ;;  %v239_v51 = vld [vmem:[%s1100_s25 + $0x1a8] sm:$0xff] }
  0x74   : > { %v535_v14 = vadd.f32 %v534_v2, %v209_v59  ;;  %v511_v35 = vadd.f32 %v510_v24, %v250_v18  ;;  %v373_v62 = vld [vmem:[%s1100_s25 + $0x5d8] sm:$0xff]  ;;  %v292_v24 = vld [vmem:[%s1100_s25 + $0x350] sm:$0xff] }
  0x75   : > { %v403_v31 = vadd.f32 %v402_v20, %v342_v15  ;;  %v484_v17 = vadd.f32 %v483_v5, %v273_v0  ;;  %v349_v20 = vld [vmem:[%s1100_s25 + $0x518] sm:$0xff]  ;;  %v433_v21 = vadd.f32 %v432_v10, %v337_v61  ;;  %v459_v22 = vadd.f32 %v458_v11, %v308_v4  ;;  %v344_v4 = vld [vmem:[%s1100_s25 + $0x4f0] sm:$0xff]  ;;  %v315_v10 = vld [vmem:[%s1100_s25 + $0x408] sm:$0xff] }
  0x76   : > { %v512_v46 = vadd.f32 %v511_v35, %v256_v29  ;;  %v245_v61 = vld [vmem:[%s1100_s25 + $0x1d8] sm:$0xff] }
  0x77   : > { %v404_v43 = vadd.f32 %v403_v31, %v348_v25  ;;  %v536_v25 = vadd.f32 %v535_v14, %v215_v7  ;;  %v485_v28 = vadd.f32 %v484_v17, %v279_v12  ;;  %v355_v31 = vld [vmem:[%s1100_s25 + $0x548] sm:$0xff]  ;;  %v434_v32 = vadd.f32 %v433_v21, %v343_v9 }
  0x78   : > { %v460_v33 = vadd.f32 %v459_v22, %v314_v16  ;;  %v513_v56 = vadd.f32 %v512_v46, %v262_v40  ;;  %v251_v7 = vld [vmem:[%s1100_s25 + $0x208] sm:$0xff]  ;;  %v257_v16 = vld [vmem:[%s1100_s25 + $0x238] sm:$0xff]  ;;  %v356_v22 = vld [vmem:[%s1100_s25 + $0x550] sm:$0xff] }
  0x79   : > { %v405_v55 = vadd.f32 %v404_v43, %v354_v26  ;;  %v486_v39 = vadd.f32 %v485_v28, %v285_v23  ;;  %v435_v43 = vadd.f32 %v434_v32, %v349_v20  ;;  %v327_v28 = vld [vmem:[%s1100_s25 + $0x468] sm:$0xff] }
  0x7a   : > { %v461_v44 = vadd.f32 %v460_v33, %v320_v27  ;;  %v514_v2 = vadd.f32 %v513_v56, %v268_v50  ;;  %v298_v33 = vld [vmem:[%s1100_s25 + $0x380] sm:$0xff]  ;;  %v281_v50 = vld [vmem:[%s1100_s25 + $0x2f8] sm:$0xff]  ;;  %v316_v56 = vld [vmem:[%s1100_s25 + $0x410] sm:$0xff] }
  0x7b   : > { %v406_v3 = vadd.f32 %v405_v55, %v360_v36  ;;  %v537_v36 = vadd.f32 %v536_v25, %v221_v19  ;;  %v487_v49 = vadd.f32 %v486_v39, %v291_v34  ;;  %v436_v53 = vadd.f32 %v435_v43, %v355_v31  ;;  %v303_v55 = vld [vmem:[%s1100_s25 + $0x3a8] sm:$0xff]  ;;  %v321_v19 = vld [vmem:[%s1100_s25 + $0x438] sm:$0xff]  ;;  %v362_v31 = vld [vmem:[%s1100_s25 + $0x580] sm:$0xff] }
  0x7c   : > { %v462_v54 = vadd.f32 %v461_v44, %v326_v38  ;;  %v263_v25 = vld [vmem:[%s1100_s25 + $0x268] sm:$0xff]  ;;  %v269_v34 = vld [vmem:[%s1100_s25 + $0x298] sm:$0xff]  ;;  %v368_v39 = vld [vmem:[%s1100_s25 + $0x5b0] sm:$0xff] }
  0x7d   : > { %v407_v15 = vadd.f32 %v406_v3, %v366_v60  ;;  %v538_v47 = vadd.f32 %v537_v36, %v227_v30  ;;  %v488_v59 = vadd.f32 %v487_v49, %v297_v45  ;;  %v274_v60 = vld [vmem:[%s1100_s25 + $0x2c0] sm:$0xff]  ;;  %v437_v63 = vadd.f32 %v436_v53, %v361_v42  ;;  %v333_v36 = vld [vmem:[%s1100_s25 + $0x498] sm:$0xff]  ;;  %v275_v42 = vld [vmem:[%s1100_s25 + $0x2c8] sm:$0xff] }
  0x7e   : > { %v463_v0 = vadd.f32 %v462_v54, %v332_v48  ;;  %v515_v11 = vadd.f32 %v514_v2, %v274_v60  ;;  %v339_v44 = vld [vmem:[%s1100_s25 + $0x4c8] sm:$0xff]  ;;  %v310_v49 = vld [vmem:[%s1100_s25 + $0x3e0] sm:$0xff]  ;;  %v357_v2 = vld [vmem:[%s1100_s25 + $0x558] sm:$0xff] }
  0x7f   : > { %v408_v26 = vadd.f32 %v407_v15, %v372_v8  ;;  %v539_v57 = vadd.f32 %v538_v47, %v233_v41  ;;  %v489_v5 = vadd.f32 %v488_v59, %v303_v55  ;;  %v438_v8 = vadd.f32 %v437_v63, %v367_v52  ;;  %v286_v15 = vld [vmem:[%s1100_s25 + $0x320] sm:$0xff]  ;;  %v304_v41 = vld [vmem:[%s1100_s25 + $0x3b0] sm:$0xff]  ;;  %v345_v52 = vld [vmem:[%s1100_s25 + $0x4f8] sm:$0xff] }
  0x80   : > { %v464_v9 = vadd.f32 %v463_v0, %v338_v58  ;;  %v516_v20 = vadd.f32 %v515_v11, %v280_v6  ;;  %v374_v47 = vld [vmem:[%s1100_s25 + $0x5e0] sm:$0xff]  ;;  %v351_v59 = vld [vmem:[%s1100_s25 + $0x528] sm:$0xff]  ;;  %v293_v0 = vld [vmem:[%s1100_s25 + $0x358] sm:$0xff] }
  0x81   : > { %v591_v37 = vmul.f32 0.001953125, %v408_v26  ;;  %v540_v3 = vadd.f32 %v539_v57, %v239_v51  ;;  %v490_v14 = vadd.f32 %v489_v5, %v309_v1  ;;  %v439_v17 = vadd.f32 %v438_v8, %v373_v62  ;;  %v287_v57 = vld [vmem:[%s1100_s25 + $0x328] sm:$0xff]  ;;  %v322_v63 = vld [vmem:[%s1100_s25 + $0x440] sm:$0xff]  ;;  %v328_v6 = vld [vmem:[%s1100_s25 + $0x470] sm:$0xff] }
  0x82   : > { %v465_v18 = vadd.f32 %v464_v9, %v344_v4  ;;  %v517_v29 = vadd.f32 %v516_v20, %v286_v15  ;;  %v363_v8 = vld [vmem:[%s1100_s25 + $0x588] sm:$0xff] }
  0x83   : > { %597 = vst [vmem:[%s1238_s15] sm:$0xff] %v591_v37  ;;  %v541_v12 = vadd.f32 %v540_v3, %v245_v61  ;;  %v491_v23 = vadd.f32 %v490_v14, %v315_v10  ;;  %v592_v26 = vmul.f32 0.001953125, %v439_v17  ;;  %v369_v14 = vld [vmem:[%s1100_s25 + $0x5b8] sm:$0xff]  ;;  %v375_v20 = vld [vmem:[%s1100_s25 + $0x5e8] sm:$0xff] }
  0x84   : > { %v466_v27 = vadd.f32 %v465_v18, %v350_v13  ;;  %v518_v37 = vadd.f32 %v517_v29, %v292_v24  ;;  %v305_v13 = vld [vmem:[%s1100_s25 + $0x3b8] sm:$0xff]  ;;  %v340_v18 = vld [vmem:[%s1100_s25 + $0x4d0] sm:$0xff]  ;;  %v346_v24 = vld [vmem:[%s1100_s25 + $0x500] sm:$0xff] }
  0x85   : > { %v542_v21 = vadd.f32 %v541_v12, %v251_v7  ;;  %v492_v32 = vadd.f32 %v491_v23, %v321_v19  ;;  %598 = vst [vmem:[%s1238_s15 + $0x8] sm:$0xff] %v592_v26  ;;  %v299_v7 = vld [vmem:[%s1100_s25 + $0x388] sm:$0xff]  ;;  %v334_v12 = vld [vmem:[%s1100_s25 + $0x4a0] sm:$0xff]  ;;  %v352_v29 = vld [vmem:[%s1100_s25 + $0x530] sm:$0xff] }
  0x86   : > { %v467_v35 = vadd.f32 %v466_v27, %v356_v22  ;;  %v519_v45 = vadd.f32 %v518_v37, %v298_v33  ;;  %v311_v19 = vld [vmem:[%s1100_s25 + $0x3e8] sm:$0xff] }
  0x87   : > { %v543_v30 = vadd.f32 %v542_v21, %v257_v16  ;;  %v493_v40 = vadd.f32 %v492_v32, %v327_v28 }
  0x88   : > { %v468_v43 = vadd.f32 %v467_v35, %v362_v31  ;;  %v520_v53 = vadd.f32 %v519_v45, %v304_v41  ;;  %v329_v35 = vld [vmem:[%s1100_s25 + $0x478] sm:$0xff] }
  0x89   : > { %v544_v38 = vadd.f32 %v543_v30, %v263_v25  ;;  %v494_v48 = vadd.f32 %v493_v40, %v333_v36  ;;  %v317_v25 = vld [vmem:[%s1100_s25 + $0x418] sm:$0xff]  ;;  %v323_v30 = vld [vmem:[%s1100_s25 + $0x448] sm:$0xff] }
  0x8a   : > { %v469_v51 = vadd.f32 %v468_v43, %v368_v39  ;;  %v521_v60 = vadd.f32 %v520_v53, %v310_v49  ;;  %v335_v39 = vld [vmem:[%s1100_s25 + $0x4a8] sm:$0xff]  ;;  %v341_v43 = vld [vmem:[%s1100_s25 + $0x4d8] sm:$0xff] }
  0x8b   : > { %v545_v46 = vadd.f32 %v544_v38, %v269_v34  ;;  %v495_v55 = vadd.f32 %v494_v48, %v339_v44  ;;  %v358_v34 = vld [vmem:[%s1100_s25 + $0x560] sm:$0xff]  ;;  %v364_v38 = vld [vmem:[%s1100_s25 + $0x590] sm:$0xff]  ;;  %v359_v53 = vld [vmem:[%s1100_s25 + $0x568] sm:$0xff] }
  0x8c   : > { %v470_v58 = vadd.f32 %v469_v51, %v374_v47  ;;  %v522_v3 = vadd.f32 %v521_v60, %v316_v56  ;;  %v347_v47 = vld [vmem:[%s1100_s25 + $0x508] sm:$0xff]  ;;  %v365_v56 = vld [vmem:[%s1100_s25 + $0x598] sm:$0xff] }
  0x8d   : > { %v546_v54 = vadd.f32 %v545_v46, %v275_v42  ;;  %v496_v62 = vadd.f32 %v495_v55, %v345_v52  ;;  %v370_v42 = vld [vmem:[%s1100_s25 + $0x5c0] sm:$0xff]  ;;  %v376_v46 = vld [vmem:[%s1100_s25 + $0x5f0] sm:$0xff]  ;;  %v377_v60 = vld [vmem:[%s1100_s25 + $0x5f8] sm:$0xff] }
  0x8e   : > { %v593_v1 = vmul.f32 0.001953125, %v470_v58  ;;  %v523_v9 = vadd.f32 %v522_v3, %v322_v63  ;;  %v371_v58 = vld [vmem:[%s1100_s25 + $0x5c8] sm:$0xff] }
  0x8f   : > { %v547_v61 = vadd.f32 %v546_v54, %v281_v50  ;;  %v497_v5 = vadd.f32 %v496_v62, %v351_v59  ;;  %v353_v50 = vld [vmem:[%s1100_s25 + $0x538] sm:$0xff] }
  0x90   : > { %599 = vst [vmem:[%s1238_s15 + $0x10] sm:$0xff] %v593_v1  ;;  %v524_v15 = vadd.f32 %v523_v9, %v328_v6 }
  0x91   : > { %v548_v4 = vadd.f32 %v547_v61, %v287_v57  ;;  %v498_v11 = vadd.f32 %v497_v5, %v357_v2 }
  0x92   : > { %v525_v21 = vadd.f32 %v524_v15, %v334_v12 }
  0x93   : > { %v549_v10 = vadd.f32 %v548_v4, %v293_v0  ;;  %v499_v17 = vadd.f32 %v498_v11, %v363_v8 }
  0x94   : > { %v526_v26 = vadd.f32 %v525_v21, %v340_v18 }
  0x95   : > { %v550_v16 = vadd.f32 %v549_v10, %v299_v7  ;;  %v500_v23 = vadd.f32 %v499_v17, %v369_v14 }
  0x96   : > { %v527_v31 = vadd.f32 %v526_v26, %v346_v24 }
  0x97   : > { %v551_v22 = vadd.f32 %v550_v16, %v305_v13  ;;  %v501_v28 = vadd.f32 %v500_v23, %v375_v20 }
  0x98   : > { %v528_v36 = vadd.f32 %v527_v31, %v352_v29 }
  0x99   : > { %v552_v27 = vadd.f32 %v551_v22, %v311_v19  ;;  %v594_v33 = vmul.f32 0.001953125, %v501_v28 }
  0x9a   : > { %v529_v40 = vadd.f32 %v528_v36, %v358_v34 }
  0x9b   : > { %v553_v32 = vadd.f32 %v552_v27, %v317_v25  ;;  %600 = vst [vmem:[%s1238_s15 + $0x18] sm:$0xff] %v594_v33 }
  0x9c   : > { %v530_v44 = vadd.f32 %v529_v40, %v364_v38 }
  0x9d   : > { %v554_v37 = vadd.f32 %v553_v32, %v323_v30 }
  0x9e   : > { %v531_v48 = vadd.f32 %v530_v44, %v370_v42 }
  0x9f   : > { %v555_v41 = vadd.f32 %v554_v37, %v329_v35 }
  0xa0   : > { %v532_v51 = vadd.f32 %v531_v48, %v376_v46 }
  0xa1   : > { %v556_v45 = vadd.f32 %v555_v41, %v335_v39 }
  0xa2   : > { %v595_v54 = vmul.f32 0.001953125, %v532_v51 }
  0xa3   : > { %v557_v49 = vadd.f32 %v556_v45, %v341_v43 }
  0xa4   : > { %601 = vst [vmem:[%s1238_s15 + $0x20] sm:$0xff] %v595_v54 }
  0xa5   : > { %v558_v52 = vadd.f32 %v557_v49, %v347_v47 }
  0xa7   : > { %v559_v55 = vadd.f32 %v558_v52, %v353_v50 }
  0xa9   : > { %v560_v57 = vadd.f32 %v559_v55, %v359_v53 }
  0xab   : > { %v561_v59 = vadd.f32 %v560_v57, %v365_v56 }
  0xad   : > { %v562_v61 = vadd.f32 %v561_v59, %v371_v58 }
  0xaf   : > { %v563_v62 = vadd.f32 %v562_v61, %v377_v60 }
  0xb1   : > { %v596_v63 = vmul.f32 0.001953125, %v563_v62 }
  0xb3   : > { %602 = vst [vmem:[%s1238_s15 + $0x28] sm:$0xff] %v596_v63 }
  0xb4   : > { %854 = shalt.err (!%p851_p10)
}
  0xb5   : > { %s855_s20 = scalar_lea.hbm %s1318_s3, 768  ;;  %s859_s25 = scalar_lea.hbm %s1377_s1, 1536 }
  0xb6   : > { %p856_p6 = scmp.ne.s32.totalorder %s1318_s3, %s855_s20  ;;  %p860_p2 = scmp.lt.u32.totalorder %s1318_s3, %s1377_s1 }
  0xb7   : > { %p861_p9 = scmp.lt.u32.totalorder %s859_s25, %s855_s20  ;;  %p863_p8 = scmp.lt.u32.totalorder %s855_s20, %s1318_s3 }
  0xb8   : > { %p857_p12 = pnand %p856_p6, %p1384_p1 }
  0xb9   : > { %p862_p11 = por %p861_p9, %p860_p2 }
  0xba   : > { %p858_p13 = pneg %p857_p12 }
  0xbb   : > { %p864_p3 = por %p863_p8, %p862_p11 }
  0xbd   : > { %p865_p5 = pnand %p864_p3, %p858_p13 }
  0xbf   : > { %868 = shalt.err (!%p865_p5)
}
  0xc0   : > { %725 = dma.vmem_to_hbm [thread:$0]  (%p1384_p1), %s1313_s19, 768, %s1318_s3, %s604_s4  }
  0xc1 PF: > { %s632_s15 = sand.u32 1, %s915_s6   ;;  %p1385_p0 = scmp.ne.s32.totalorder %s1382_s29, 0 }
  0xc2   : > { %p1386_p4 = scmp.ge.s32.totalorder %s947_s14, 2  ;;  %s633_s18 = scalar_lea.sflag [#allocation5], %s632_s15 }
  0xc4   : > { %p732_p7 = pnand %p1386_p4, %p1385_p0 }
  0xc6   : > { %910 = dma.done.wait (!%p732_p7), %s633_s18, 768  }
  0xc7   : > { %912 = vsyncadd (!%p732_p7), %s633_s18, 4294966528  ;;  %s17_s14 = sadd.s32 1, %s947_s14   ;;  %s1387_s6 = smov %s919_s7 }
  0xc8   : > { %p14_p10 = scmp.ge.s32.totalorder %s17_s14, 4   ;;  %s1388_s7 = smov %s923_s8 }
  0xc9   : > { %s1389_s8 = smov %s1035_s26  ;;  %s1390_s9 = smov %s931_s10 }
  0xca   : > { %s1391_s10 = smov %s935_s11  ;;  %s1392_s11 = smov %s1038_s27 }
  0xcb   : > { %s1393_s12 = smov %s943_s13  ;;  %s1394_s13 = smov %s1396_s17 }
  0xcc   :  { %16 = sbr.rel (!%p14_p10) target bundleno = 8 (0x8), region = 77 }
  0xd3   :  { %638 = vsyncpa [#allocation4], 1 }
  0xd4   :  { %640 = vsyncpa [#allocation4 + $0x1], 1 }
  0xd5   :  { %641 = vsyncpa [#allocation5], 1 }
  0xd6   :  { %643 = vsyncpa [#allocation5 + $0x1], 1 }

</bundles_post_ra>
